<compile_context>
chip_gen: v5e
topology: v5e:2x2
jax: 0.10.0
libtpu: 0.0.40
codegen_flags: <defaults>
</compile_context>

<pallas_src>
import functools

import jax
import jax.numpy as jnp
from jax.experimental import pallas as pl
from jax.experimental.pallas import tpu as pltpu


_LANE = 128
_MAX_BLOCK_ROWS = 1024      # (1024, 128) f32 block = 512 KiB per pipeline buffer


def _round_up(x, m):
    return (x + m - 1) // m * m


# ---------------------------------------------------------------------------
# Kernel 1: SpAdjDropEdge -- Bernoulli edge drop + 1/keepRate rescale
# ---------------------------------------------------------------------------
def _drop_edge_kernel(vals_ref, u_ref, out_ref, *, threshold, inv_keep_rate):
    # torch: keep = floor(rand + keepRate).bool()  <=>  rand >= 1 - keepRate
    keep = u_ref[...] >= threshold
    out_ref[...] = jnp.where(keep, vals_ref[...] * inv_keep_rate, 0.0)


def sp_adj_drop_edge(key, idxs, vals, adj_shape, keep_rate):
    """Fixed-size equivalent of SpAdjDropEdge.forward.

    Returns (idxs, new_vals, adj_shape). Kept edges are scaled by 1/keep_rate,
    dropped edges have new_vals == 0 (indices unchanged).
    """
    if keep_rate >= 1.0:
        return idxs, vals.astype(jnp.float32), adj_shape

    e = vals.shape[0]
    rows = _round_up(e, _LANE) // _LANE
    block_rows = min(_MAX_BLOCK_ROWS, _round_up(rows, 8))
    rows_pad = _round_up(rows, block_rows)
    e_pad = rows_pad * _LANE

    vals2d = jnp.pad(vals.astype(jnp.float32), (0, e_pad - e)).reshape(rows_pad, _LANE)
    # uniforms generated directly in the padded 2-D (rows, 128) layout: no extra pad pass
    u2d = jax.random.uniform(key, (rows_pad, _LANE), dtype=jnp.float32)

    spec = pl.BlockSpec((block_rows, _LANE), lambda i: (i, 0))
    kernel = functools.partial(
        _drop_edge_kernel,
        threshold=float(1.0 - keep_rate),
        inv_keep_rate=float(1.0 / keep_rate),
    )
    new2d = pl.pallas_call(
        kernel,
        out_shape=jax.ShapeDtypeStruct((rows_pad, _LANE), jnp.float32),
        grid=(rows_pad // block_rows,),
        in_specs=[spec, spec],
        out_specs=spec,
        compiler_params=pltpu.CompilerParams(
            dimension_semantics=("parallel",)),
    )(vals2d, u2d)

    new_vals = new2d.reshape(-1)[:e]
    # TODO(synk): PyTorch compacts (idxs[:, mask], vals[mask]); dynamic-shape compaction
    # is not expressible under jit/Pallas, so dropped edges are kept with value 0.
    return idxs, new_vals, adj_shape


# ---------------------------------------------------------------------------
# Kernel 2: fused HGCNConv -- LeakyReLU(adj @ (adj.T @ embs)) in one pallas_call
# ---------------------------------------------------------------------------
def _hgcn_conv_kernel(adj_t_ref, embs_ref, adj_row_ref, o_ref, tmp_ref, *, leaky):
    # tmp = adj.T @ embs is computed once (grid is sequential, "arbitrary") and kept
    # resident in VMEM scratch across all row tiles -> no HBM round trip.
    @pl.when(pl.program_id(0) == 0)
    def _():
        tmp_ref[...] = jnp.dot(adj_t_ref[...], embs_ref[...],
                               preferred_element_type=jnp.float32)
    acc = jnp.dot(adj_row_ref[...], tmp_ref[...], preferred_element_type=jnp.float32)
    if leaky is not None:
        acc = jnp.where(acc > 0, acc, leaky * acc)
    o_ref[...] = acc.astype(o_ref.dtype)


def hgcn_conv(adj, embs, leaky, act=True, block_m=256):
    """out = act(adj @ (adj.T @ embs)) with a fused LeakyReLU epilogue.

    TODO(synk): torch.sparse.mm is emulated with a dense adjacency that is kept fully
    resident in VMEM (demo scale); tile N / K for production-sized graphs.
    """
    adj = adj.astype(jnp.float32)
    embs = embs.astype(jnp.float32)
    n = adj.shape[0]
    d = embs.shape[1]
    bm = min(block_m, _round_up(n, 8))
    n_pad = _round_up(n, bm)
    adj_rows = jnp.pad(adj, ((0, n_pad - n), (0, 0)))

    out = pl.pallas_call(
        functools.partial(_hgcn_conv_kernel, leaky=(float(leaky) if act else None)),
        out_shape=jax.ShapeDtypeStruct((n_pad, d), jnp.float32),
        grid=(n_pad // bm,),
        in_specs=[pl.BlockSpec((n, n), lambda i: (0, 0)),   # adj.T, resident
                  pl.BlockSpec((n, d), lambda i: (0, 0)),   # embs, resident
                  pl.BlockSpec((bm, n), lambda i: (i, 0))], # row tile of adj
        out_specs=pl.BlockSpec((bm, d), lambda i: (i, 0)),
        scratch_shapes=[pltpu.VMEM((n, d), jnp.float32)],
        compiler_params=pltpu.CompilerParams(
            dimension_semantics=("arbitrary",)),            # scratch carried across grid
    )(adj.T, embs, adj_rows)
    return out[:n]


# ---------------------------------------------------------------------------
# Kernel 3: row-tiled linear with fused bias add and optional ReLU epilogue
# ---------------------------------------------------------------------------
def _linear_kernel(x_ref, w_ref, b_ref, o_ref, *, relu):
    acc = jnp.dot(x_ref[...], w_ref[...], preferred_element_type=jnp.float32)
    acc = acc + b_ref[...]
    if relu:
        acc = jnp.maximum(acc, 0.0)
    o_ref[...] = acc.astype(o_ref.dtype)


def pallas_linear(x, w, b, relu=False, block_m=256):
    """nn.Linear: y = x @ w.T + b (w is (out, in)), optional fused ReLU."""
    x = x.astype(jnp.float32)
    w_t = w.T.astype(jnp.float32)
    b2 = b.reshape(1, -1).astype(jnp.float32)
    m, k = x.shape
    n = w_t.shape[1]
    bm = min(block_m, _round_up(m, 8))
    m_pad = _round_up(m, bm)
    x_p = jnp.pad(x, ((0, m_pad - m), (0, 0)))
    # TODO(synk): output last dim (32 here) is lane-sparse; pad to 128 lanes for large N.
    out = pl.pallas_call(
        functools.partial(_linear_kernel, relu=relu),
        out_shape=jax.ShapeDtypeStruct((m_pad, n), jnp.float32),
        grid=(m_pad // bm,),
        in_specs=[pl.BlockSpec((bm, k), lambda i: (i, 0)),
                  pl.BlockSpec((k, n), lambda i: (0, 0)),
                  pl.BlockSpec((1, n), lambda i: (0, 0))],
        out_specs=pl.BlockSpec((bm, n), lambda i: (i, 0)),
        compiler_params=pltpu.CompilerParams(
            dimension_semantics=("parallel",)),
    )(x_p, w_t, b2)
    return out[:m]


# ---------------------------------------------------------------------------
# ugformer layer (TransformerEncoder(TransformerEncoderLayer, 1, norm), eval mode)
# ---------------------------------------------------------------------------
def _layer_norm(x, g, b, eps=1e-5):
    m = jnp.mean(x, axis=-1, keepdims=True)
    v = jnp.mean((x - m) ** 2, axis=-1, keepdims=True)
    return (x - m) * jax.lax.rsqrt(v + eps) * g + b


def _self_attention(x, p, n_heads):
    s, h = x.shape
    hd = h // n_heads
    qkv = pallas_linear(x, p["in_proj_w"], p["in_proj_b"])     # (S, 3H)
    q, k, v = jnp.split(qkv, 3, axis=-1)
    q = q.reshape(s, n_heads, hd).transpose(1, 0, 2)            # (nh, S, hd)
    k = k.reshape(s, n_heads, hd).transpose(1, 0, 2)
    v = v.reshape(s, n_heads, hd).transpose(1, 0, 2)
    # TODO(synk): per-head softmax attention left to XLA; a flash-attention Pallas
    # kernel would be needed for large node counts.
    scores = jnp.einsum("hqd,hkd->hqk", q, k) / jnp.sqrt(float(hd))
    probs = jax.nn.softmax(scores, axis=-1)
    ctx = jnp.einsum("hqk,hkd->hqd", probs, v)
    ctx = ctx.transpose(1, 0, 2).reshape(s, h)
    return pallas_linear(ctx, p["out_proj_w"], p["out_proj_b"])


def ugformer_layer(x, p, n_heads=2):
    a = _self_attention(x, p, n_heads)
    x = _layer_norm(x + a, p["ln1_g"], p["ln1_b"])
    h = pallas_linear(x, p["ff1_w"], p["ff1_b"], relu=True)     # fused ReLU epilogue
    h = pallas_linear(h, p["ff2_w"], p["ff2_b"])
    x = _layer_norm(x + h, p["ln2_g"], p["ln2_b"])
    return _layer_norm(x, p["norm_g"], p["norm_b"])             # TransformerEncoder final norm


# ---------------------------------------------------------------------------
# HGCN_Encoder.forward
# ---------------------------------------------------------------------------
def _hgcn_encoder_forward(params, adj_idxs, adj_vals, drop_key, *,
                          adj_shape, n_users, n_layers, leaky, keep_rate):
    ego = jnp.concatenate([params["user_emb"], params["item_emb"]], axis=0)
    res = ego
    _, dvals, _ = sp_adj_drop_edge(drop_key, adj_idxs, adj_vals, adj_shape, keep_rate)
    adj = jnp.zeros(adj_shape, jnp.float32).at[adj_idxs[0], adj_idxs[1]].add(dvals)
    for k in range(n_layers):
        ego = ugformer_layer(ego, params["ugformer"][k])        # unsqueeze/squeeze: batch=1
        ego = hgcn_conv(adj, ego, leaky, act=(k != n_layers - 1))
    final = ego + res                                            # all_embeddings[-1] += res
    return final[:n_users], final[n_users:]


hgcn_encoder_forward = jax.jit(
    _hgcn_encoder_forward,
    static_argnames=("adj_shape", "n_users", "n_layers", "leaky", "keep_rate"))


def _init_params(key, n_users, n_items, hyper_size, n_layers, ffn_size=32):
    keys = jax.random.split(key, 2 + n_layers)

    def xavier(k, shape):
        bound = (6.0 / (shape[0] + shape[1])) ** 0.5
        return jax.random.uniform(k, shape, jnp.float32, -bound, bound)

    params = {
        "user_emb": xavier(keys[0], (n_users, hyper_size)),
        "item_emb": xavier(keys[1], (n_items, hyper_size)),
        "ugformer": [],
    }
    h, f = hyper_size, ffn_size
    for i in range(n_layers):
        ks = jax.random.split(keys[2 + i], 4)
        params["ugformer"].append({
            "in_proj_w": xavier(ks[0], (3 * h, h)),
            "in_proj_b": jnp.zeros((3 * h,), jnp.float32),
            "out_proj_w": xavier(ks[1], (h, h)),
            "out_proj_b": jnp.zeros((h,), jnp.float32),
            "ln1_g": jnp.ones((h,), jnp.float32),
            "ln1_b": jnp.zeros((h,), jnp.float32),
            "ff1_w": xavier(ks[2], (f, h)),
            "ff1_b": jnp.zeros((f,), jnp.float32),
            "ff2_w": xavier(ks[3], (h, f)),
            "ff2_b": jnp.zeros((h,), jnp.float32),
            "ln2_g": jnp.ones((h,), jnp.float32),
            "ln2_b": jnp.zeros((h,), jnp.float32),
            "norm_g": jnp.ones((h,), jnp.float32),
            "norm_b": jnp.zeros((h,), jnp.float32),
        })
    return params


if __name__ == "__main__":
    key = jax.random.PRNGKey(0)
    k_param, k_idx, k_val, k_drop = jax.random.split(key, 4)

    n_users, n_items, hyper_size, n_layers = 24, 40, 32, 2
    leaky, keep_rate = 0.5, 0.7
    n_nodes = n_users + n_items
    E = 300
    adj_shape = (n_nodes, n_nodes)

    idxs = jax.random.randint(k_idx, (2, E), 0, n_nodes, dtype=jnp.int32)
    vals = jax.random.uniform(k_val, (E,), dtype=jnp.float32) + 0.1

    params = _init_params(k_param, n_users, n_items, hyper_size, n_layers)

    # --- SpAdjDropEdge kernel sanity checks --------------------------------
    _, new_vals, _ = sp_adj_drop_edge(k_drop, idxs, vals, adj_shape, keep_rate)
    new_vals = jax.block_until_ready(new_vals)
    kept = new_vals > 0.0
    assert int(kept.sum()) > 0
    assert bool(jnp.allclose(jnp.where(kept, new_vals, 0.0),
                             jnp.where(kept, vals / keep_rate, 0.0),
                             rtol=1e-5, atol=1e-6))
    _, v_same, _ = sp_adj_drop_edge(k_drop, idxs, vals, adj_shape, 1.0)
    assert bool(jnp.all(v_same == vals))

    # --- fused HGCNConv kernel sanity check vs. plain-JAX reference --------
    adj_dense = jnp.zeros(adj_shape, jnp.float32).at[idxs[0], idxs[1]].add(new_vals)
    embs = jnp.concatenate([params["user_emb"], params["item_emb"]], axis=0)
    ref = adj_dense @ (adj_dense.T @ embs)
    ref = jnp.where(ref > 0, ref, leaky * ref)
    out = jax.block_until_ready(hgcn_conv(adj_dense, embs, leaky, act=True))
    assert bool(jnp.allclose(out, ref, rtol=1e-4, atol=1e-4))

    # --- fused linear kernel sanity check -----------------------------------
    p0 = params["ugformer"][0]
    lin_ref = embs @ p0["in_proj_w"].T + p0["in_proj_b"]
    lin_out = jax.block_until_ready(pallas_linear(embs, p0["in_proj_w"], p0["in_proj_b"]))
    assert bool(jnp.allclose(lin_out, lin_ref, rtol=1e-4, atol=1e-4))

    # --- full HGCN_Encoder forward (jitted) ----------------------------------
    user_out, item_out = hgcn_encoder_forward(
        params, idxs, vals, k_drop,
        adj_shape=adj_shape, n_users=n_users, n_layers=n_layers,
        leaky=leaky, keep_rate=keep_rate)
    user_out = jax.block_until_ready(user_out)
    item_out = jax.block_until_ready(item_out)
    assert user_out.shape == (n_users, hyper_size)
    assert item_out.shape == (n_items, hyper_size)
    assert bool(jnp.all(jnp.isfinite(user_out)))
    assert bool(jnp.all(jnp.isfinite(item_out)))

    print("KERNEL_OK")
</pallas_src>

<mosaic_0001>
module attributes {stable_mosaic.version = 11 : i64} {
  func.func @_drop_edge_kernel(%arg0: i32, %arg1: memref<8x128xf32, #tpu.memory_space<vmem>>, %arg2: memref<8x128xf32, #tpu.memory_space<vmem>>, %arg3: memref<8x128xf32, #tpu.memory_space<vmem>>) attributes {dimension_semantics = [#tpu.dimension_semantics<parallel>], iteration_bounds = array<i64: 1>, scalar_prefetch = 0 : i64, scratch_operands = 0 : i64, tpu.core_type = #tpu.core_type<tc>, window_params = [{transform_indices = @transform_0, window_bounds = array<i64: 8, 128>}, {transform_indices = @transform_1, window_bounds = array<i64: 8, 128>}, {transform_indices = @transform_2, window_bounds = array<i64: 8, 128>}]} {
    %c0 = arith.constant 0 : index
    %c0_0 = arith.constant 0 : index
    %0 = vector.load %arg2[%c0, %c0_0] : memref<8x128xf32, #tpu.memory_space<vmem>>, vector<8x128xf32>
    %cst = arith.constant 3.000000e-01 : f32
    %1 = vector.broadcast %cst : f32 to vector<8x128xf32>
    %2 = arith.cmpf oge, %0, %1 : vector<8x128xf32>
    %c0_1 = arith.constant 0 : index
    %c0_2 = arith.constant 0 : index
    %3 = vector.load %arg1[%c0_1, %c0_2] : memref<8x128xf32, #tpu.memory_space<vmem>>, vector<8x128xf32>
    %cst_3 = arith.constant 1.42857146 : f32
    %4 = vector.broadcast %cst_3 : f32 to vector<8x128xf32>
    %5 = arith.mulf %3, %4 : vector<8x128xf32>
    %cst_4 = arith.constant 0.000000e+00 : f32
    %6 = vector.broadcast %cst_4 : f32 to vector<8x128xf32>
    %7 = arith.select %2, %5, %6 : vector<8x128xi1>, vector<8x128xf32>
    %c0_5 = arith.constant 0 : index
    %c0_6 = arith.constant 0 : index
    %8 = vector.load %arg3[%c0_5, %c0_6] : memref<8x128xf32, #tpu.memory_space<vmem>>, vector<8x128xf32>
    tpu.vector_store %arg3[%c0_5, %c0_6], %7 {strides = array<i32>} : memref<8x128xf32, #tpu.memory_space<vmem>>, vector<8x128xf32>,
    return
  }
  func.func @transform_0(%arg0: i32) -> (i32, i32) {
    %c0_i32 = arith.constant 0 : i32
    %c0_i32_0 = arith.constant 0 : i32
    return %arg0, %c0_i32 : i32, i32
  }
  func.func @transform_1(%arg0: i32) -> (i32, i32) {
    %c0_i32 = arith.constant 0 : i32
    %c0_i32_0 = arith.constant 0 : i32
    return %arg0, %c0_i32 : i32, i32
  }
  func.func @transform_2(%arg0: i32) -> (i32, i32) {
    %c0_i32 = arith.constant 0 : i32
    %c0_i32_0 = arith.constant 0 : i32
    return %arg0, %c0_i32 : i32, i32
  }
}

</mosaic_0001>

<bundles_post_ra>
// kernel: tpu_custom_call.1
= control target key start
LH: loop header
LB: loop body
LE: loop exit
PB: predicated region body
PF: predicated region fallthrough
CT: control target
= control target key end

     0   :  { %7 = vsyncpa [#allocation3], 0  ;;  %s172_s0 = inlined_call_operand.hbm [shape: f32[8,128], index: 0, kind: input, shape index: {}]   ;;  %s173_s1 = inlined_call_operand.hbm [shape: f32[8,128], index: 1, kind: input, shape index: {}]   ;;  %s174_s2 = inlined_call_operand.hbm [shape: f32[8,128], index: 2, kind: output, shape index: {}]  }
   0x1   :  { %8 = vsyncpa [#allocation6], 0 }
   0x2   :  { %9 = vsyncpa [#allocation4], 0  ;;  %s15_s11 = sshll.u32 %s172_s0, 4  ;;  %s145_s12 = smov [#allocation2]   ;;  %s16_s11 = int_to_ptr.hbm [resolvable:$true] %s15_s11 }
   0x3   :  { %s17_s13 = sshll.u32 %s145_s12, 4  ;;  %s26_s16 = sshll.u32 %s173_s1, 4  ;;  %s18_s13 = int_to_ptr.vmem [resolvable:$true] %s17_s13  ;;  %s27_s16 = int_to_ptr.hbm [resolvable:$true] %s26_s16 }
   0x4   :  { %20 = dma.hbm_to_vmem [thread:$0]  %s16_s11, 128, %s18_s13, [#allocation3]  }
   0x5   :  { %s146_s17 = smov [#allocation5]  }
   0x6   :  { %s28_s18 = sshll.u32 %s146_s17, 4  ;;  %s29_s18 = int_to_ptr.vmem [resolvable:$true] %s28_s18 }
   0x7   :  { %31 = dma.hbm_to_vmem [thread:$0]  %s27_s16, 128, %s29_s18, [#allocation6]  }
   0x8   :  { %139 = dma.done.wait [#allocation3], 128  }
   0x9   :  { %140 = vsyncadd [#allocation3], 4294967168 }
   0xa   :  { %141 = dma.done.wait [#allocation6], 128  }
   0xb   :  { %142 = vsyncadd [#allocation6], 4294967168  ;;  %s147_s19 = smov [#allocation7]   ;;  %s53_s22 = sshll.u32 %s174_s2, 4  ;;  %v40_v0 = vld [vmem:[#allocation5] sm:$0xff]  ;;  %v42_v1 = vld [vmem:[#allocation2] sm:$0xff]  ;;  %s54_s22 = int_to_ptr.hbm [resolvable:$true] %s53_s22 }
   0xc   :  { %s51_s0 = sshll.u32 %s147_s19, 4  ;;  %vm41_vm0 = vcmp.ge.f32.partialorder %v40_v0, 0.3  ;;  %v43_v2 = vmul.f32 1.4285715, %v42_v1  ;;  %s52_s0 = int_to_ptr.vmem [resolvable:$true] %s51_s0 }
   0xe   :  { %v44_v3 = vsel %vm41_vm0, %v43_v2, 0.0 }
   0xf   :  { %45 = vst [vmem:[#allocation7] sm:$0xff] %v44_v3 }
  0x10   :  { %56 = dma.vmem_to_hbm [thread:$0]  %s52_s0, 128, %s54_s22, [#allocation4]  }
  0x11   :  { %143 = dma.done.wait [#allocation4], 128  }
  0x12   :  { %144 = vsyncadd [#allocation4], 4294967168 }
  0x13   :  { %61 = vsyncpa [#allocation3], 1 }
  0x14   :  { %62 = vsyncpa [#allocation6], 1 }
  0x15   :  { %63 = vsyncpa [#allocation4], 1 }

</bundles_post_ra>
